<compile_context>
chip_gen: v6e
topology: v6e:2x2x1
jax: 0.10.0
libtpu: 0.0.40
codegen_flags: <defaults>
</compile_context>

<pallas_src>
import functools
import math

import jax
import jax.numpy as jnp
from jax.experimental import pallas as pl
from jax.experimental.pallas import tpu as pltpu


def _round_up(x, m):
    return ((x + m - 1) // m) * m


def _sigmoid(x):
    return 1.0 / (1.0 + jnp.exp(-x))


# ----------------------------- Pallas kernels ------------------------------

def _matmul_bias_kernel(x_ref, w_ref, b_ref, o_ref):
    # bf16 operands, f32 accumulation, lane-dense f32 output tile.
    o_ref[...] = (
        jnp.dot(x_ref[...], w_ref[...], preferred_element_type=jnp.float32)
        + b_ref[...])


def linear_pallas(x, w, b, tm=256):
    """y = x @ w + b, row-tiled; operands cast to bf16, Din/Dout padded to 128."""
    M, Din = x.shape
    Dout = w.shape[1]
    Mp = _round_up(M, tm)
    Dinp = _round_up(Din, 128)
    Doutp = _round_up(Dout, 128)
    xb = jnp.pad(x, ((0, Mp - M), (0, Dinp - Din))).astype(jnp.bfloat16)
    wb = jnp.pad(w, ((0, Dinp - Din), (0, Doutp - Dout))).astype(jnp.bfloat16)
    bb = jnp.pad(b, (0, Doutp - Dout)).reshape(1, Doutp).astype(jnp.float32)
    out = pl.pallas_call(
        _matmul_bias_kernel,
        out_shape=jax.ShapeDtypeStruct((Mp, Doutp), jnp.float32),
        grid=(Mp // tm,),
        in_specs=[
            pl.BlockSpec((tm, Dinp), lambda i: (i, 0)),
            pl.BlockSpec((Dinp, Doutp), lambda i: (0, 0)),
            pl.BlockSpec((1, Doutp), lambda i: (0, 0)),
        ],
        out_specs=pl.BlockSpec((tm, Doutp), lambda i: (i, 0)),
        compiler_params=pltpu.CompilerParams(
            dimension_semantics=("parallel",),
            vmem_limit_bytes=32 << 20),
    )(xb, wb, bb)
    return out[:M, :Dout]


def _act_hafm_kernel(o_ref, lines_ref, jloc_ref, joff_ref, *, width, height):
    """Fused head activations + HAFM decoding on the (9, H*W) raw output map.

    Outputs:
      lines_ref: (12, HW) = [xst(3 signs); yst(3); xed(3); yed(3)]
      jloc_ref : (1, HW)  softmax(ch5,ch6)[1]
      joff_ref : (2, HW)  sigmoid - 0.5
    All math kept in f32 (EUP transcendentals; v5e has no bf16 VPU/EUP).
    """
    o = o_ref[...]
    hw = o.shape[1]

    # grouped sigmoid over rows 0..4 (md x3, dis, res) -> single vector op.
    s = _sigmoid(o[0:5, :])
    md = s[0:3, :]
    dis = s[3:4, :]
    res = s[4:5, :]

    # jloc: 2-way channel softmax, channel 1.
    p = o[5:6, :]
    q = o[6:7, :]
    m = jnp.maximum(p, q)
    ep = jnp.exp(p - m)
    eq = jnp.exp(q - m)
    jloc_ref[...] = eq / (ep + eq)
    joff_ref[...] = _sigmoid(o[7:9, :]) - 0.5

    # HAFM decoding.
    pix = jax.lax.broadcasted_iota(jnp.int32, (1, hw), 1)
    x0 = (pix % width).astype(jnp.float32)
    y0 = (pix // width).astype(jnp.float32)
    sign = jax.lax.broadcasted_iota(jnp.float32, (3, 1), 0) - 1.0       # [-1, 0, 1]
    df = jnp.clip(dis + res * sign, 0.0, 1.0)                            # (3, hw)
    md_un = (md[0:1, :] - 0.5) * (2.0 * math.pi)
    st_un = md[1:2, :] * (math.pi / 2.0)
    ed_un = -md[2:3, :] * (math.pi / 2.0)
    cs = jnp.cos(md_un)
    ss = jnp.sin(md_un)
    # tan(); cos() never returns exactly 0 in f32, so this stays finite like torch.tan.
    yst = jnp.sin(st_un) / jnp.cos(st_un)
    yed = jnp.sin(ed_un) / jnp.cos(ed_un)
    scale = 2.0
    lines_ref[0:3, :] = jnp.clip((cs - ss * yst) * df * scale + x0, 0.0, width - 1)
    lines_ref[3:6, :] = jnp.clip((ss + cs * yst) * df * scale + y0, 0.0, height - 1)
    lines_ref[6:9, :] = jnp.clip((cs - ss * yed) * df * scale + x0, 0.0, width - 1)
    lines_ref[9:12, :] = jnp.clip((ss + cs * yed) * df * scale + y0, 0.0, height - 1)


def act_hafm_pallas(out_flat, H, W):
    HW = H * W
    return pl.pallas_call(
        functools.partial(_act_hafm_kernel, width=W, height=H),
        out_shape=(jax.ShapeDtypeStruct((12, HW), jnp.float32),
                   jax.ShapeDtypeStruct((1, HW), jnp.float32),
                   jax.ShapeDtypeStruct((2, HW), jnp.float32)),
    )(out_flat)


def _nms_kernel(a_ref, o_ref, *, height, width):
    """3x3 max-pool (pad=1) NMS via separable XLU rolls + edge masks."""
    a = a_ref[...]
    Hp, Wp = a.shape
    NEG = jnp.float32(-1e30)
    col = jax.lax.broadcasted_iota(jnp.int32, (Hp, Wp), 1)
    row = jax.lax.broadcasted_iota(jnp.int32, (Hp, Wp), 0)
    # horizontal (lane) neighbours
    east = jnp.where(col == width - 1, NEG, pltpu.roll(a, Wp - 1, axis=1))
    west = jnp.where(col == 0, NEG, pltpu.roll(a, 1, axis=1))
    hmax = jnp.maximum(a, jnp.maximum(east, west))
    # vertical (sublane) neighbours
    south = jnp.where(row == height - 1, NEG, pltpu.roll(hmax, Hp - 1, axis=0))
    north = jnp.where(row == 0, NEG, pltpu.roll(hmax, 1, axis=0))
    mx = jnp.maximum(hmax, jnp.maximum(north, south))
    o_ref[...] = a * (a == mx).astype(a.dtype)


def nms_pallas(jloc_2d):
    H, W = jloc_2d.shape
    Hp = _round_up(H, 8)
    Wp = _round_up(W, 128)
    a = jnp.pad(jloc_2d, ((0, Hp - H), (0, Wp - W)), constant_values=-1e30)
    out = pl.pallas_call(
        functools.partial(_nms_kernel, height=H, width=W),
        out_shape=jax.ShapeDtypeStruct((Hp, Wp), jnp.float32),
    )(a)
    # TODO(synk): for very large H, grid-tile over row blocks with a 1-row halo.
    return out[:H, :W]


def _match_cost_kernel(juncs_ref, pen_ref, lines_ref, dis_ref, idx_ref):
    """Per-line nearest junction for both endpoints (min + argmin over K)."""
    jx = juncs_ref[:, 0:1]           # (K, 1)
    jy = juncs_ref[:, 1:2]
    pen = pen_ref[...]               # (K, 1) 0 for valid juncs, huge otherwise
    ln = lines_ref[...]              # (4, TL)
    c1 = (ln[0:1, :] - jx) ** 2 + (ln[1:2, :] - jy) ** 2 + pen   # (K, TL)
    c2 = (ln[2:3, :] - jx) ** 2 + (ln[3:4, :] - jy) ** 2 + pen
    kk = jax.lax.broadcasted_iota(jnp.int32, c1.shape, 0)
    big = jnp.int32(2 ** 30)
    m1 = jnp.min(c1, axis=0, keepdims=True)
    m2 = jnp.min(c2, axis=0, keepdims=True)
    i1 = jnp.min(jnp.where(c1 == m1, kk, big), axis=0, keepdims=True)
    i2 = jnp.min(jnp.where(c2 == m2, kk, big), axis=0, keepdims=True)
    dis_ref[0:1, :] = m1
    dis_ref[1:2, :] = m2
    idx_ref[0:1, :] = i1
    idx_ref[1:2, :] = i2


def match_cost_pallas(juncs, penalty, lines_rows):
    """juncs (K,2), penalty (K,1), lines_rows (4,L) -> dis (2,L) f32, idx (2,L) i32."""
    K = juncs.shape[0]
    L = lines_rows.shape[1]
    TL = min(2048, _round_up(L, 128))
    Lp = _round_up(L, TL)
    lines_p = jnp.pad(lines_rows, ((0, 0), (0, Lp - L)))
    dis_out, idx_out = pl.pallas_call(
        _match_cost_kernel,
        out_shape=(jax.ShapeDtypeStruct((2, Lp), jnp.float32),
                   jax.ShapeDtypeStruct((2, Lp), jnp.int32)),
        grid=(Lp // TL,),
        in_specs=[
            pl.BlockSpec((K, 2), lambda i: (0, 0)),
            pl.BlockSpec((K, 1), lambda i: (0, 0)),
            pl.BlockSpec((4, TL), lambda i: (0, i)),
        ],
        out_specs=(pl.BlockSpec((2, TL), lambda i: (0, i)),
                   pl.BlockSpec((2, TL), lambda i: (0, i))),
        compiler_params=pltpu.CompilerParams(
            dimension_semantics=("parallel",),
            vmem_limit_bytes=32 << 20),
    )(juncs, penalty, lines_p)
    return dis_out[:, :L], idx_out[:, :L]


def _fused_mlp_kernel(xf_ref, xr_ref, w0_ref, b0_ref, w2_ref, b2_ref,
                      w4_ref, b4_ref, wr_ref, br_ref, wh_ref, bh_ref, s_ref):
    """fc2 (3-layer MLP) + fc2_res + residual add + fc2_head + softmax[:,1].

    All intermediates stay in VMEM; matmul operands are bf16, accumulation f32.
    The 2-class head is folded into a single padded column: softmax(l)[1] ==
    sigmoid(l1 - l0) == sigmoid(z @ (wh[:,1]-wh[:,0]) + (bh1-bh0)).
    """
    h = jnp.dot(xf_ref[...], w0_ref[...], preferred_element_type=jnp.float32) + b0_ref[...]
    h = jnp.maximum(h, 0.0)
    h = jnp.dot(h.astype(jnp.bfloat16), w2_ref[...], preferred_element_type=jnp.float32) + b2_ref[...]
    h = jnp.maximum(h, 0.0)
    h = jnp.dot(h.astype(jnp.bfloat16), w4_ref[...], preferred_element_type=jnp.float32) + b4_ref[...]
    r = jnp.dot(xr_ref[...], wr_ref[...], preferred_element_type=jnp.float32) + br_ref[...]
    r = jnp.maximum(r, 0.0)
    z = (h + r).astype(jnp.bfloat16)
    d = jnp.dot(z, wh_ref[...], preferred_element_type=jnp.float32) + bh_ref[...]
    s_ref[...] = _sigmoid(d)     # lane 0 holds softmax(logits)[:, 1]


def fused_mlp_pallas(line_features, res_features, params, tm=128):
    """Returns softmax(fc2_head(fc2(x) + fc2_res(r)))[:, 1] for every row."""
    L, Df = line_features.shape          # Df = 496
    Dr = res_features.shape[1]           # Dr = 240
    Dfp = _round_up(Df, 128)             # 512
    Drp = _round_up(Dr, 128)             # 256
    Lp = _round_up(L, tm)

    xf = jnp.pad(line_features, ((0, Lp - L), (0, Dfp - Df))).astype(jnp.bfloat16)
    xr = jnp.pad(res_features, ((0, Lp - L), (0, Drp - Dr))).astype(jnp.bfloat16)
    w0 = jnp.pad(params['fc2_0_w'], ((0, Dfp - Df), (0, 0))).astype(jnp.bfloat16)
    wr = jnp.pad(params['fc2_res_w'], ((0, Drp - Dr), (0, 0))).astype(jnp.bfloat16)
    w2 = params['fc2_2_w'].astype(jnp.bfloat16)
    w4 = params['fc2_4_w'].astype(jnp.bfloat16)
    wh = params['fc2_head_w']
    whd = jnp.pad(wh[:, 1:2] - wh[:, 0:1], ((0, 0), (0, 127))).astype(jnp.bfloat16)
    bh = params['fc2_head_b']
    bhd = jnp.full((1, 128), bh[1] - bh[0], jnp.float32)
    b0 = params['fc2_0_b'].reshape(1, -1).astype(jnp.float32)
    b2 = params['fc2_2_b'].reshape(1, -1).astype(jnp.float32)
    b4 = params['fc2_4_b'].reshape(1, -1).astype(jnp.float32)
    br = params['fc2_res_b'].reshape(1, -1).astype(jnp.float32)
    Dh = w2.shape[1]                     # 1024

    inv = lambda i: (0, 0)               # grid-invariant weights / biases
    # TODO(synk): pipeline_mode=pl.Buffered(1) on the invariant weight specs would
    # halve their VMEM footprint; with bf16 weights (~5.7 MB) the default double
    # buffering already fits well within the 40 MB budget, so it is left default.
    scores = pl.pallas_call(
        _fused_mlp_kernel,
        out_shape=jax.ShapeDtypeStruct((Lp, 128), jnp.float32),
        grid=(Lp // tm,),
        in_specs=[
            pl.BlockSpec((tm, Dfp), lambda i: (i, 0)),
            pl.BlockSpec((tm, Drp), lambda i: (i, 0)),
            pl.BlockSpec((Dfp, Dh), inv),
            pl.BlockSpec((1, Dh), inv),
            pl.BlockSpec((Dh, Dh), inv),
            pl.BlockSpec((1, Dh), inv),
            pl.BlockSpec((Dh, Dh), inv),
            pl.BlockSpec((1, Dh), inv),
            pl.BlockSpec((Drp, Dh), inv),
            pl.BlockSpec((1, Dh), inv),
            pl.BlockSpec((Dh, 128), inv),
            pl.BlockSpec((1, 128), inv),
        ],
        out_specs=pl.BlockSpec((tm, 128), lambda i: (i, 0)),
        compiler_params=pltpu.CompilerParams(
            dimension_semantics=("parallel",),
            vmem_limit_bytes=40 << 20),
    )(xf, xr, w0, b0, w2, b2, w4, b4, wr, br, whd, bhd)
    return scores[:L, 0]


# ------------------------------ JAX glue ops --------------------------------

def bilinear_sampling(features, points):
    """features: (C, H, W); points: (M, 2) as (x, y). Returns (C, M)."""
    h, w = features.shape[1], features.shape[2]
    px, py = points[:, 0], points[:, 1]
    px0 = jnp.clip(jnp.floor(px), 0, w - 1)
    py0 = jnp.clip(jnp.floor(py), 0, h - 1)
    px1 = jnp.clip(px0 + 1, 0, w - 1)
    py1 = jnp.clip(py0 + 1, 0, h - 1)
    px0l = px0.astype(jnp.int32)
    py0l = py0.astype(jnp.int32)
    px1l = px1.astype(jnp.int32)
    py1l = py1.astype(jnp.int32)
    xp = (features[:, py0l, px0l] * (py1 - py) * (px1 - px)
          + features[:, py1l, px0l] * (py - py0) * (px1 - px)
          + features[:, py0l, px1l] * (py1 - py) * (px - px0)
          + features[:, py1l, px1l] * (py - py0) * (px - px0))
    return xp


def compute_loi_features(features, lines, tspan):
    """features (C,H,W), lines (M,4), tspan (T,). Returns (M, C*T)."""
    C = features.shape[0]
    T = tspan.shape[0]
    U, V = lines[:, :2], lines[:, 2:]
    sampled = (U[:, :, None] * tspan[None, None, :]
               + V[:, :, None] * (1.0 - tspan[None, None, :]) - 0.5)   # (M, 2, T)
    sampled = jnp.transpose(sampled, (0, 2, 1)).reshape(-1, 2)          # (M*T, 2)
    xp = bilinear_sampling(features, sampled)                           # (C, M*T)
    xp = xp.reshape(C, -1, T)
    xp = jnp.transpose(xp, (1, 0, 2)).reshape(-1, C * T)
    return xp


# ------------------------------- Forward pass --------------------------------

def hawp_headers_forward(params, in_distillation, size, topk=64):
    features = in_distillation['features']      # (1, 256, H, W)
    afm = in_distillation['afm']                # (1, 5, H, W)
    junctions = in_distillation['junctions']    # (1, 4, H, W)
    outputs = jnp.concatenate([afm, junctions], axis=1)   # (1, 9, H, W)

    _, c_feat, H, W = features.shape
    HW = H * W

    # ---- fc1 / fc3 / fc4 (1x1 convs) fused into one bf16 Pallas matmul ----
    feat_flat = features[0].reshape(c_feat, HW).T                        # (HW, 256)
    w_all = jnp.concatenate([params['fc1_w'], params['fc3_w'], params['fc4_w']], axis=1)
    b_all = jnp.concatenate([params['fc1_b'], params['fc3_b'], params['fc4_b']], axis=0)
    conv_out = linear_pallas(feat_flat, w_all, b_all, tm=256)            # (HW, 136)
    loi_features = conv_out[:, :128].T.reshape(128, H, W)
    loi_features_thin = conv_out[:, 128:132].T.reshape(4, H, W)
    loi_features_aux = conv_out[:, 132:136].T.reshape(4, H, W)

    # ---- fused head activations + HAFM decoding -> line proposals ----
    out_flat = outputs[0].reshape(9, HW)
    lines12, jloc_row, joff_pred = act_hafm_pallas(out_flat, H, W)
    L = 3 * HW
    lines_rows = lines12.reshape(4, L)        # (4, L): rows xst, yst, xed, yed
    lines_pred = lines_rows.T                 # (L, 4)
    jloc_pred = jloc_row.reshape(H, W)

    # ---- junction NMS + top-k ----
    jloc_nms = nms_pallas(jloc_pred)
    KJ = topk
    # TODO(synk): PyTorch uses data-dependent topK=min(300, count>0.008); static KJ + mask here.
    scores_j, index = jax.lax.top_k(jloc_nms.reshape(-1), KJ)
    yj = (index // W).astype(jnp.float32) + joff_pred[1, index] + 0.5
    xj = (index % W).astype(jnp.float32) + joff_pred[0, index] + 0.5
    juncs = jnp.stack([xj, yj], axis=1)                                   # (KJ, 2)
    junc_valid = scores_j > 0.008
    penalty = jnp.where(junc_valid, 0.0, 1e12).reshape(KJ, 1).astype(jnp.float32)

    # ---- wireframe matcher: lane-tiled cost matrices + argmin in Pallas ----
    dis_out, idx_out = match_cost_pallas(juncs, penalty, lines_rows)
    dis1, dis2 = dis_out[0], dis_out[1]
    idx1, idx2 = idx_out[0], idx_out[1]

    idx_min = jnp.minimum(idx1, idx2)
    idx_max = jnp.maximum(idx1, idx2)
    iskeep = (idx_min < idx_max) & (dis1 < 10.0) & (dis2 < 10.0)

    cand = jnp.concatenate([juncs[idx_min], juncs[idx_max]], axis=1)      # (L, 4)
    ca = jnp.sum((cand - lines_pred) ** 2, axis=-1)
    cb = jnp.sum((cand - lines_pred[:, jnp.array([2, 3, 0, 1])]) ** 2, axis=-1)
    cost_atoi = jnp.minimum(ca, cb)

    # emulate: filter(iskeep) -> argsort(cost_atoi desc) -> np.unique(pairs, return_index)
    BIG = KJ * KJ + 10
    pair_key = jnp.where(iskeep, idx_min * KJ + idx_max, BIG)
    ord1 = jnp.argsort(-cost_atoi)                    # stable, desc by cost_atoi
    ord2 = jnp.argsort(pair_key[ord1])                # stable, asc by pair key
    order = ord1[ord2]
    sorted_keys = pair_key[order]
    is_first = jnp.concatenate(
        [jnp.array([True]), sorted_keys[1:] != sorted_keys[:-1]])
    rep_mask = is_first & (sorted_keys < BIG)
    ord3 = jnp.argsort(jnp.logical_not(rep_mask).astype(jnp.int32))       # compact reps first
    final_order = order[ord3]
    valid = rep_mask[ord3]
    n_valid = jnp.sum(rep_mask)

    lines_init = lines_pred[final_order]                                  # (L, 4)
    i0 = idx_min[final_order]
    i1_ = idx_max[final_order]
    lines_adjusted = jnp.concatenate([juncs[i0], juncs[i1_]], axis=1)     # (L, 4)

    # ---- LOI feature pooling (bilinear gathers, plain JAX) ----
    e1 = bilinear_sampling(loi_features, lines_adjusted[:, :2] - 0.5).T   # (L, 128)
    e2 = bilinear_sampling(loi_features, lines_adjusted[:, 2:] - 0.5).T   # (L, 128)
    tspan = jnp.linspace(0.0, 1.0, 32)[1:-1]                              # (30,)
    f1 = compute_loi_features(loi_features_thin, lines_adjusted, tspan)   # (L, 120)
    f2 = compute_loi_features(loi_features_aux, lines_init, tspan)        # (L, 120)
    line_features = jnp.concatenate([e1, e2, f1, f2], axis=-1)            # (L, 496)
    res_features = jnp.concatenate([f1, f2], axis=-1)                     # (L, 240)

    # ---- fc2 / fc2_res / fc2_head / softmax[:,1] fused into one Pallas kernel ----
    scores_line = fused_mlp_pallas(line_features, res_features, params)   # (L,)

    scores_m = jnp.where(valid, scores_line, -jnp.inf)
    sarg = jnp.argsort(-scores_m)
    lines_sorted = lines_adjusted[sarg]
    score_sorted = scores_m[sarg]
    num_detection = jnp.minimum(jnp.sum(score_sorted > 0.0), 1000)
    # TODO(synk): dynamic truncation to num_detection is not expressible with static shapes;
    # returned as a per-row mask instead.
    det_mask = jnp.arange(L) < num_detection

    sx = size[0] / W
    sy = size[1] / H
    lines_final = lines_sorted * jnp.array([sx, sy, sx, sy], jnp.float32)
    juncs_final = juncs * jnp.array([sx, sy], jnp.float32)

    return {
        'lines_pred': lines_final,
        'lines_score': score_sorted,
        'lines_valid_mask': det_mask,
        'juncs_pred': juncs_final,
        'juncs_score': scores_j,
        'juncs_valid_mask': junc_valid,
        'num_proposals': n_valid,
        'num_detection': num_detection,
        'filename': '',
        'width': size[0],
        'height': size[1],
    }


# ------------------------------- Parameters ----------------------------------

def init_params(key):
    def lin(k, din, dout):
        k1, k2 = jax.random.split(k)
        s = 1.0 / math.sqrt(din)
        w = jax.random.uniform(k1, (din, dout), jnp.float32, -s, s)
        b = jax.random.uniform(k2, (dout,), jnp.float32, -s, s)
        return w, b

    keys = jax.random.split(key, 8)
    p = {}
    p['fc1_w'], p['fc1_b'] = lin(keys[0], 256, 128)      # Conv2d(256,128,1)
    p['fc3_w'], p['fc3_b'] = lin(keys[1], 256, 4)        # Conv2d(256,4,1)
    p['fc4_w'], p['fc4_b'] = lin(keys[2], 256, 4)        # Conv2d(256,4,1)
    p['fc2_0_w'], p['fc2_0_b'] = lin(keys[3], 496, 1024)
    p['fc2_2_w'], p['fc2_2_b'] = lin(keys[4], 1024, 1024)
    p['fc2_4_w'], p['fc2_4_b'] = lin(keys[5], 1024, 1024)
    p['fc2_head_w'], p['fc2_head_b'] = lin(keys[6], 1024, 2)
    p['fc2_res_w'], p['fc2_res_b'] = lin(keys[7], 240, 1024)
    return p


# ---------------------------------- Main --------------------------------------

if __name__ == "__main__":
    key = jax.random.PRNGKey(0)
    kf, ka, kj, kp = jax.random.split(key, 4)
    B, H, W = 1, 16, 16
    in_distillation = {
        'features': jax.random.normal(kf, (B, 256, H, W), jnp.float32) * 0.5,
        'afm': jax.random.normal(ka, (B, 5, H, W), jnp.float32),
        'junctions': jax.random.normal(kj, (B, 4, H, W), jnp.float32),
    }
    params = init_params(kp)
    size = (32.0, 32.0)   # (width, height), as stored in HawpHeaders.size

    out = hawp_headers_forward(params, in_distillation, size)
    jax.block_until_ready(out['lines_pred'])
    jax.block_until_ready(out['lines_score'])
    jax.block_until_ready(out['juncs_pred'])
    print("KERNEL_OK")
</pallas_src>

<mosaic_0001>
module attributes {stable_mosaic.version = 11 : i64} {
  func.func @_matmul_bias_kernel(%arg0: i32, %arg1: memref<256x256xbf16, #tpu.memory_space<vmem>>, %arg2: memref<256x256xbf16, #tpu.memory_space<vmem>>, %arg3: memref<1x256xf32, #tpu.memory_space<vmem>>, %arg4: memref<256x256xf32, #tpu.memory_space<vmem>>) attributes {dimension_semantics = [#tpu.dimension_semantics<parallel>], iteration_bounds = array<i64: 1>, scalar_prefetch = 0 : i64, scratch_operands = 0 : i64, tpu.core_type = #tpu.core_type<tc>, window_params = [{transform_indices = @transform_0, window_bounds = array<i64: 256, 256>}, {pipeline_mode = #tpu.pipeline_mode<synchronous>, transform_indices = @transform_1, window_bounds = array<i64: 256, 256>}, {pipeline_mode = #tpu.pipeline_mode<synchronous>, transform_indices = @transform_2, window_bounds = array<i64: 1, 256>}, {transform_indices = @transform_3, window_bounds = array<i64: 256, 256>}]} {
    %c0 = arith.constant 0 : index
    %c0_0 = arith.constant 0 : index
    %0 = vector.load %arg1[%c0, %c0_0] : memref<256x256xbf16, #tpu.memory_space<vmem>>, vector<256x256xbf16>
    %c0_1 = arith.constant 0 : index
    %c0_2 = arith.constant 0 : index
    %1 = vector.load %arg2[%c0_1, %c0_2] : memref<256x256xbf16, #tpu.memory_space<vmem>>, vector<256x256xbf16>
    %cst = arith.constant dense<0.000000e+00> : vector<256x256xf32>
    %2 = tpu.matmul %0, %1, %cst {dimension_numbers = #tpu.dot_dimension_numbers<[1], [0], [0], [1], [0, 0, 1, 1], [], []>} : vector<256x256xbf16>, vector<256x256xbf16>, vector<256x256xf32> -> vector<256x256xf32>
    %c0_3 = arith.constant 0 : index
    %c0_4 = arith.constant 0 : index
    %3 = vector.load %arg3[%c0_3, %c0_4] : memref<1x256xf32, #tpu.memory_space<vmem>>, vector<1x256xf32>
    %4 = vector.broadcast %3 : vector<1x256xf32> to vector<256x256xf32>
    %5 = arith.addf %2, %4 : vector<256x256xf32>
    %c0_5 = arith.constant 0 : index
    %c0_6 = arith.constant 0 : index
    %6 = vector.load %arg4[%c0_5, %c0_6] : memref<256x256xf32, #tpu.memory_space<vmem>>, vector<256x256xf32>
    tpu.vector_store %arg4[%c0_5, %c0_6], %5 {strides = array<i32>} : memref<256x256xf32, #tpu.memory_space<vmem>>, vector<256x256xf32>,
    return
  }
  func.func @transform_0(%arg0: i32) -> (i32, i32) {
    %c0_i32 = arith.constant 0 : i32
    %c0_i32_0 = arith.constant 0 : i32
    return %arg0, %c0_i32 : i32, i32
  }
  func.func @transform_1(%arg0: i32) -> (i32, i32) {
    %c0_i32 = arith.constant 0 : i32
    %c0_i32_0 = arith.constant 0 : i32
    %c0_i32_1 = arith.constant 0 : i32
    return %c0_i32, %c0_i32_0 : i32, i32
  }
  func.func @transform_2(%arg0: i32) -> (i32, i32) {
    %c0_i32 = arith.constant 0 : i32
    %c0_i32_0 = arith.constant 0 : i32
    %c0_i32_1 = arith.constant 0 : i32
    return %c0_i32, %c0_i32_0 : i32, i32
  }
  func.func @transform_3(%arg0: i32) -> (i32, i32) {
    %c0_i32 = arith.constant 0 : i32
    %c0_i32_0 = arith.constant 0 : i32
    return %arg0, %c0_i32 : i32, i32
  }
}

</mosaic_0001>

<bundles_post_ra>
// kernel: tpu_custom_call.1
= control target key start
LH: loop header
LB: loop body
LE: loop exit
PB: predicated region body
PF: predicated region fallthrough
CT: control target
= control target key end

     0   :  { %8 = vsyncpa [#allocation3], 0  ;;  %s1086_s0 = inlined_call_operand.hbm [shape: bf16[256,256], index: 0, kind: input, shape index: {}]   ;;  %s1087_s1 = inlined_call_operand.hbm [shape: bf16[256,256], index: 1, kind: input, shape index: {}]   ;;  %s1088_s2 = inlined_call_operand.vmem [shape: f32[1,256], index: 2, kind: input, shape index: {}]   ;;  %s1089_s3 = inlined_call_operand.hbm [shape: f32[256,256], index: 3, kind: output, shape index: {}]  }
   0x1   :  { %9 = vsyncpa [#allocation6], 0 }
   0x2   :  { %10 = vsyncpa [#allocation4], 0  ;;  %s979_s12 = smov [#allocation2]  }
   0x3   :  { %s16_s13 = sshll.u32 %s979_s12, 4  ;;  %s17_s13 = int_to_ptr.vmem [resolvable:$true] %s16_s13 }
   0x4   :  { %s921_s14 = scalar_lea.vmem %s17_s13, 4096  ;;  %p926_p1 = scmp.lt.s32.totalorder %s17_s13, %s17_s13 }
   0x5   :  { %p922_p0 = scmp.ne.s32.totalorder %s17_s13, %s921_s14  ;;  %p927_p2 = scmp.lt.s32.totalorder %s921_s14, %s921_s14 }
   0x7   :  { %p928_p3 = por %p927_p2, %p926_p1 }
   0x9   :  { %p929_p4 = pnand %p928_p3, %p922_p0 }
   0xb   :  { %932 = shalt.err (!%p929_p4)
}
   0xc   :  { %s980_s15 = smov 128   ;;  %s981_s16 = smov 8  }
   0xd   :  { %22 = dma.hbm_to_vmem [thread:$0]  %s1086_s0, 4096, %s17_s13, [#allocation3], %s980_s15, %s980_s15, %s981_s16  }
   0xe   :  { %s982_s19 = smov [#allocation5]  }
   0xf   :  { %s28_s20 = sshll.u32 %s982_s19, 4  ;;  %s29_s20 = int_to_ptr.vmem [resolvable:$true] %s28_s20 }
  0x10   :  { %s941_s21 = scalar_lea.vmem %s29_s20, 4096  ;;  %p946_p6 = scmp.lt.s32.totalorder %s29_s20, %s29_s20 }
  0x11   :  { %p942_p5 = scmp.ne.s32.totalorder %s29_s20, %s941_s21  ;;  %p947_p7 = scmp.lt.s32.totalorder %s941_s21, %s941_s21 }
  0x13   :  { %p948_p8 = por %p947_p7, %p946_p6 }
  0x15   :  { %p949_p9 = pnand %p948_p8, %p942_p5 }
  0x17   :  { %952 = shalt.err (!%p949_p9)
}
  0x18   :  { %34 = dma.hbm_to_vmem [thread:$0]  %s1087_s1, 4096, %s29_s20, [#allocation6], %s980_s15, %s980_s15, %s981_s16  }
  0x19   :  { %973 = dma.done.wait [#allocation3], 4096  }
  0x1a   :  { %974 = vsyncadd [#allocation3], 4294963200 }
  0x1b   :  { %975 = dma.done.wait [#allocation6], 4096  }
  0x1c   :  { %976 = vsyncadd [#allocation6], 4294963200  ;;  %v817_v0 = vld [vmem:[#allocation5 + $0x74] ss:$8 sps:$4 sm:$0xff]   ;;  %v819_v1 = vld [vmem:[#allocation5 + $0x70] ss:$8 sps:$4 sm:$0xff]  }
  0x1d   :  { %439 = vmatprep.subr.bf16.mxu0 %v817_v0  ;;  %778 = vmatprep.subr.bf16.mxu1 %v817_v0  ;;  %v820_v2 = vld [vmem:[#allocation5 + $0x64] ss:$8 sps:$4 sm:$0xff]   ;;  %v822_v3 = vld [vmem:[#allocation5 + $0x60] ss:$8 sps:$4 sm:$0xff]   ;;  %v823_v4 = vld [vmem:[#allocation5 + $0x54] ss:$8 sps:$4 sm:$0xff]   ;;  %v109_v0 = vlaneseq }
  0x1e   :  { %440 = vmatpush1.bf16.msra.mxu0 %v819_v1  ;;  %794 = vmatpush1.bf16.msra.mxu1 %v819_v1  ;;  %v825_v5 = vld [vmem:[#allocation5 + $0x50] ss:$8 sps:$4 sm:$0xff]   ;;  %v826_v6 = vld [vmem:[#allocation5 + $0x44] ss:$8 sps:$4 sm:$0xff]   ;;  %v828_v7 = vld [vmem:[#allocation5 + $0x40] ss:$8 sps:$4 sm:$0xff]  }
  0x1f   :  { %441 = vmatprep.subr.bf16.mxu0 %v820_v2  ;;  %779 = vmatprep.subr.bf16.mxu1 %v820_v2  ;;  %v829_v8 = vld [vmem:[#allocation5 + $0x34] ss:$8 sps:$4 sm:$0xff]   ;;  %v831_v9 = vld [vmem:[#allocation5 + $0x30] ss:$8 sps:$4 sm:$0xff]   ;;  %v832_v10 = vld [vmem:[#allocation5 + $0x24] ss:$8 sps:$4 sm:$0xff]  }
  0x20   :  { %v834_v11 = vld [vmem:[#allocation5 + $0x20] ss:$8 sps:$4 sm:$0xff]   ;;  %v835_v12 = vld [vmem:[#allocation5 + $0x14] ss:$8 sps:$4 sm:$0xff]   ;;  %v867_v13 = vld [vmem:[#allocation2 + $0x4] ss:$8 sps:$4 sm:$0xff]  }
  0x21   :  { %v837_v14 = vld [vmem:[#allocation5 + $0x10] ss:$8 sps:$4 sm:$0xff]   ;;  %v870_v15 = vld [vmem:[#allocation2 + $0x84] ss:$8 sps:$4 sm:$0xff]   ;;  %471 = vmatprep.mubr.bf16.mxu0 %v867_v13  ;;  %v840_v17 = vld [vmem:[#allocation5] ss:$8 sps:$4 sm:$0xff]  }
  0x22   :  { %442 = vmatpush1.bf16.msra.mxu0 %v822_v3  ;;  %795 = vmatpush1.bf16.msra.mxu1 %v822_v3  ;;  %v838_v16 = vld [vmem:[#allocation5 + $0x4] ss:$8 sps:$4 sm:$0xff]   ;;  %v841_v18 = vld [vmem:[#allocation5 + $0xf4] ss:$8 sps:$4 sm:$0xff]   ;;  %v843_v19 = vld [vmem:[#allocation5 + $0xf0] ss:$8 sps:$4 sm:$0xff]  }
  0x23   :  { %443 = vmatprep.subr.bf16.mxu0 %v823_v4  ;;  %780 = vmatprep.subr.bf16.mxu1 %v823_v4  ;;  %v844_v20 = vld [vmem:[#allocation5 + $0xe4] ss:$8 sps:$4 sm:$0xff]   ;;  %v846_v21 = vld [vmem:[#allocation5 + $0xe0] ss:$8 sps:$4 sm:$0xff]   ;;  %v847_v22 = vld [vmem:[#allocation5 + $0xd4] ss:$8 sps:$4 sm:$0xff]  }
  0x24   :  { %551 = vmatprep.mubr.bf16.mxu1 %v870_v15  ;;  %v849_v23 = vld [vmem:[#allocation5 + $0xd0] ss:$8 sps:$4 sm:$0xff]   ;;  %v850_v24 = vld [vmem:[#allocation5 + $0xc4] ss:$8 sps:$4 sm:$0xff]   ;;  %v852_v25 = vld [vmem:[#allocation5 + $0xc0] ss:$8 sps:$4 sm:$0xff]  }
  0x25   :  { %v853_v26 = vld [vmem:[#allocation5 + $0xb4] ss:$8 sps:$4 sm:$0xff]   ;;  %v855_v27 = vld [vmem:[#allocation5 + $0xb0] ss:$8 sps:$4 sm:$0xff]   ;;  %v856_v28 = vld [vmem:[#allocation5 + $0xa4] ss:$8 sps:$4 sm:$0xff]  }
  0x26   :  { %444 = vmatpush1.bf16.msra.mxu0 %v825_v5  ;;  %796 = vmatpush1.bf16.msra.mxu1 %v825_v5  ;;  %v858_v29 = vld [vmem:[#allocation5 + $0xa0] ss:$8 sps:$4 sm:$0xff]   ;;  %v859_v30 = vld [vmem:[#allocation5 + $0x94] ss:$8 sps:$4 sm:$0xff]   ;;  %v861_v31 = vld [vmem:[#allocation5 + $0x90] ss:$8 sps:$4 sm:$0xff]  }
  0x27   :  { %445 = vmatprep.subr.bf16.mxu0 %v826_v6  ;;  %781 = vmatprep.subr.bf16.mxu1 %v826_v6  ;;  %v862_v32 = vld [vmem:[#allocation5 + $0x84] ss:$8 sps:$4 sm:$0xff]   ;;  %v864_v33 = vld [vmem:[#allocation5 + $0x80] ss:$8 sps:$4 sm:$0xff]   ;;  %v871_v36 = vld [vmem:[#allocation2 + $0x14] ss:$8 sps:$4 sm:$0xff]  }
  0x28   :  { %v865_v34 = vld [vmem:[#allocation2] ss:$8 sps:$4 sm:$0xff]   ;;  %v873_v37 = vld [vmem:[#allocation2 + $0x94] ss:$8 sps:$4 sm:$0xff]   ;;  %v875_v38 = vld [vmem:[#allocation2 + $0x10] ss:$8 sps:$4 sm:$0xff]  }
  0x29   :  { %v868_v35 = vld [vmem:[#allocation2 + $0x80] ss:$8 sps:$4 sm:$0xff]   ;;  %v876_v39 = vld [vmem:[#allocation2 + $0x90] ss:$8 sps:$4 sm:$0xff]   ;;  %v877_v40 = vld [vmem:[#allocation2 + $0x24] ss:$8 sps:$4 sm:$0xff]  }
  0x2a   :  { %446 = vmatpush1.bf16.msra.mxu0 %v828_v7  ;;  %797 = vmatpush1.bf16.msra.mxu1 %v828_v7  ;;  %v879_v41 = vld [vmem:[#allocation2 + $0xa4] ss:$8 sps:$4 sm:$0xff]   ;;  %v881_v42 = vld [vmem:[#allocation2 + $0x20] ss:$8 sps:$4 sm:$0xff]   ;;  %v883_v44 = vld [vmem:[#allocation2 + $0x34] ss:$8 sps:$4 sm:$0xff]  }
  0x2b   :  { %447 = vmatprep.subr.bf16.mxu0 %v829_v8  ;;  %782 = vmatprep.subr.bf16.mxu1 %v829_v8  ;;  %v882_v43 = vld [vmem:[#allocation2 + $0xa0] ss:$8 sps:$4 sm:$0xff]   ;;  %v885_v45 = vld [vmem:[#allocation2 + $0xb4] ss:$8 sps:$4 sm:$0xff]   ;;  %v887_v46 = vld [vmem:[#allocation2 + $0x30] ss:$8 sps:$4 sm:$0xff]  }
  0x2c   :  { %v888_v47 = vld [vmem:[#allocation2 + $0xb0] ss:$8 sps:$4 sm:$0xff]   ;;  %v889_v48 = vld [vmem:[#allocation2 + $0x44] ss:$8 sps:$4 sm:$0xff]   ;;  %v893_v50 = vld [vmem:[#allocation2 + $0x40] ss:$8 sps:$4 sm:$0xff]  }
  0x2d   :  { %v891_v49 = vld [vmem:[#allocation2 + $0xc4] ss:$8 sps:$4 sm:$0xff]   ;;  %v894_v51 = vld [vmem:[#allocation2 + $0xc0] ss:$8 sps:$4 sm:$0xff]   ;;  %v895_v52 = vld [vmem:[#allocation2 + $0x54] ss:$8 sps:$4 sm:$0xff]  }
  0x2e   :  { %448 = vmatpush1.bf16.msra.mxu0 %v831_v9  ;;  %798 = vmatpush1.bf16.msra.mxu1 %v831_v9  ;;  %v897_v53 = vld [vmem:[#allocation2 + $0xd4] ss:$8 sps:$4 sm:$0xff]   ;;  %v899_v54 = vld [vmem:[#allocation2 + $0x50] ss:$8 sps:$4 sm:$0xff]   ;;  %v901_v56 = vld [vmem:[#allocation2 + $0x64] ss:$8 sps:$4 sm:$0xff]  }
  0x2f   :  { %449 = vmatprep.subr.bf16.mxu0 %v832_v10  ;;  %783 = vmatprep.subr.bf16.mxu1 %v832_v10  ;;  %v900_v55 = vld [vmem:[#allocation2 + $0xd0] ss:$8 sps:$4 sm:$0xff]   ;;  %v903_v57 = vld [vmem:[#allocation2 + $0xe4] ss:$8 sps:$4 sm:$0xff]   ;;  %v905_v58 = vld [vmem:[#allocation2 + $0x60] ss:$8 sps:$4 sm:$0xff]  }
  0x30   :  { %v906_v59 = vld [vmem:[#allocation2 + $0xe0] ss:$8 sps:$4 sm:$0xff]   ;;  %v907_v60 = vld [vmem:[#allocation2 + $0x74] ss:$8 sps:$4 sm:$0xff]   ;;  %v911_v62 = vld [vmem:[#allocation2 + $0x70] ss:$8 sps:$4 sm:$0xff]  }
  0x31   :  { %v909_v61 = vld [vmem:[#allocation2 + $0xf4] ss:$8 sps:$4 sm:$0xff]   ;;  %v912_v63 = vld [vmem:[#allocation2 + $0xf0] ss:$8 sps:$4 sm:$0xff]   ;;  %v110_v1 = vshrl.u32 %v109_v0, 7 }
  0x32   :  { %450 = vmatpush1.bf16.msra.mxu0 %v834_v11  ;;  %799 = vmatpush1.bf16.msra.mxu1 %v834_v11  ;;  %v107_v3 = vld [vmem:[%s1088_s2] sm:$0x3]  ;;  %s983_s2 = smov [#allocation7]  }
  0x33   :  { %451 = vmatprep.subr.bf16.mxu0 %v835_v12  ;;  %784 = vmatprep.subr.bf16.mxu1 %v835_v12  ;;  %v111_v2 = vsub.s32 0, %v110_v1  ;;  %v115_v4 = vsub.s32 1, %v110_v1  ;;  %s701_s24 = sshll.u32 %s983_s2, 4  ;;  %s702_s24 = int_to_ptr.vmem [resolvable:$true] %s701_s24 }
  0x34   :  { %s953_s25 = scalar_lea.vmem %s702_s24, 8192  ;;  %p958_p11 = scmp.lt.s32.totalorder %s702_s24, %s702_s24 }
  0x35   :  { %v1015_v5 = vrot.slane %v107_v3, %v111_v2  ;;  %v1017_v6 = vrot.slane %v107_v3, %v115_v4  ;;  %p954_p10 = scmp.ne.s32.totalorder %s702_s24, %s953_s25  ;;  %p959_p12 = scmp.lt.s32.totalorder %s953_s25, %s953_s25 }
  0x36   :  { %452 = vmatpush1.bf16.msra.mxu0 %v837_v14  ;;  %800 = vmatpush1.bf16.msra.mxu1 %v837_v14 }
  0x37   :  { %453 = vmatprep.subr.bf16.mxu0 %v838_v16  ;;  %785 = vmatprep.subr.bf16.mxu1 %v838_v16  ;;  %p960_p13 = por %p959_p12, %p958_p11 }
  0x39   :  { %p961_p0 = pnand %p960_p13, %p954_p10 }
  0x3a   :  { %454 = vmatpush1.bf16.msra.mxu0 %v840_v17  ;;  %801 = vmatpush1.bf16.msra.mxu1 %v840_v17 }
  0x3b   :  { %455 = vmatprep.subr.bf16.mxu0 %v841_v18  ;;  %786 = vmatprep.subr.bf16.mxu1 %v841_v18 }
  0x3e   :  { %456 = vmatpush2.bf16.msra.mxu0 %v843_v19  ;;  %802 = vmatpush2.bf16.msra.mxu1 %v843_v19 }
  0x3f   :  { %457 = vmatprep.subr.bf16.mxu0 %v844_v20  ;;  %787 = vmatprep.subr.bf16.mxu1 %v844_v20 }
  0x42   :  { %458 = vmatpush2.bf16.msra.mxu0 %v846_v21  ;;  %803 = vmatpush2.bf16.msra.mxu1 %v846_v21 }
  0x43   :  { %459 = vmatprep.subr.bf16.mxu0 %v847_v22  ;;  %788 = vmatprep.subr.bf16.mxu1 %v847_v22 }
  0x46   :  { %460 = vmatpush2.bf16.msra.mxu0 %v849_v23  ;;  %804 = vmatpush2.bf16.msra.mxu1 %v849_v23 }
  0x47   :  { %461 = vmatprep.subr.bf16.mxu0 %v850_v24  ;;  %789 = vmatprep.subr.bf16.mxu1 %v850_v24 }
  0x4a   :  { %462 = vmatpush2.bf16.msra.mxu0 %v852_v25  ;;  %805 = vmatpush2.bf16.msra.mxu1 %v852_v25 }
  0x4b   :  { %463 = vmatprep.subr.bf16.mxu0 %v853_v26  ;;  %790 = vmatprep.subr.bf16.mxu1 %v853_v26 }
  0x4e   :  { %464 = vmatpush2.bf16.msra.mxu0 %v855_v27  ;;  %806 = vmatpush2.bf16.msra.mxu1 %v855_v27 }
  0x4f   :  { %465 = vmatprep.subr.bf16.mxu0 %v856_v28  ;;  %791 = vmatprep.subr.bf16.mxu1 %v856_v28 }
  0x52   :  { %466 = vmatpush2.bf16.msra.mxu0 %v858_v29  ;;  %807 = vmatpush2.bf16.msra.mxu1 %v858_v29 }
  0x53   :  { %467 = vmatprep.subr.bf16.mxu0 %v859_v30  ;;  %792 = vmatprep.subr.bf16.mxu1 %v859_v30 }
  0x56   :  { %468 = vmatpush2.bf16.msra.mxu0 %v861_v31  ;;  %808 = vmatpush2.bf16.msra.mxu1 %v861_v31 }
  0x57   :  { %469 = vmatprep.subr.bf16.mxu0 %v862_v32  ;;  %793 = vmatprep.subr.bf16.mxu1 %v862_v32 }
  0x5a   :  { %470 = vmatpush2.bf16.msra.mxu0 %v864_v33  ;;  %809 = vmatpush2.bf16.msra.mxu1 %v864_v33 }
  0x5d   :  { %472 = vmatmul.mubr.bf16.vlgmr.msra.gmra.mxu0 %v865_v34  ;;  %552 = vmatmul.mubr.bf16.vlgmr.msra.gmra.mxu1 %v868_v35 }
  0x5e   :  { %481 = vmatprep.mubr.bf16.mxu0 %v871_v36  ;;  %561 = vmatprep.mubr.bf16.mxu1 %v873_v37 }
  0x65   :  { %482 = vmatmul.mubr.bf16.gmra.mxu0 %v875_v38  ;;  %562 = vmatmul.mubr.bf16.gmra.mxu1 %v876_v39 }
  0x66   :  { %491 = vmatprep.mubr.bf16.mxu0 %v877_v40  ;;  %571 = vmatprep.mubr.bf16.mxu1 %v879_v41 }
  0x6d   :  { %492 = vmatmul.mubr.bf16.gmra.mxu0 %v881_v42  ;;  %572 = vmatmul.mubr.bf16.gmra.mxu1 %v882_v43 }
  0x6e   :  { %501 = vmatprep.mubr.bf16.mxu0 %v883_v44  ;;  %581 = vmatprep.mubr.bf16.mxu1 %v885_v45 }
  0x75   :  { %502 = vmatmul.mubr.bf16.gmra.mxu0 %v887_v46  ;;  %582 = vmatmul.mubr.bf16.gmra.mxu1 %v888_v47 }
  0x76   :  { %511 = vmatprep.mubr.bf16.mxu0 %v889_v48  ;;  %591 = vmatprep.mubr.bf16.mxu1 %v891_v49 }
  0x7d   :  { %512 = vmatmul.mubr.bf16.gmra.mxu0 %v893_v50  ;;  %592 = vmatmul.mubr.bf16.gmra.mxu1 %v894_v51 }
  0x7e   :  { %521 = vmatprep.mubr.bf16.mxu0 %v895_v52  ;;  %601 = vmatprep.mubr.bf16.mxu1 %v897_v53 }
  0x85   :  { %522 = vmatmul.mubr.bf16.gmra.mxu0 %v899_v54  ;;  %602 = vmatmul.mubr.bf16.gmra.mxu1 %v900_v55 }
  0x86   :  { %531 = vmatprep.mubr.bf16.mxu0 %v901_v56  ;;  %611 = vmatprep.mubr.bf16.mxu1 %v903_v57 }
  0x8d   :  { %532 = vmatmul.mubr.bf16.gmra.mxu0 %v905_v58  ;;  %612 = vmatmul.mubr.bf16.gmra.mxu1 %v906_v59 }
  0x8e   :  { %541 = vmatprep.mubr.bf16.mxu0 %v907_v60  ;;  %621 = vmatprep.mubr.bf16.mxu1 %v909_v61 }
  0x95   :  { %542 = vmatmul.mubr.bf16.gmra.mxu0 %v911_v62  ;;  %622 = vmatmul.mubr.bf16.gmra.mxu1 %v912_v63 }
 0x11d   :  { %v473_v7 = vpop.f32.mrf.mxu0  ;;  %v553_v8 = vpop.f32.mrf.mxu1 }
 0x11e   :  { %v474_v9 = vadd.f32 %v473_v7, %v1015_v5  ;;  %v554_v10 = vadd.f32 %v553_v8, %v1015_v5 }
 0x11f   :  { %v475_v11 = vpop.f32.mrf.mxu0  ;;  %v555_v12 = vpop.f32.mrf.mxu1 }
 0x120   :  { %632 = vst [vmem:[#allocation7] sm:$0xff] %v474_v9  ;;  %664 = vst [vmem:[#allocation7 + $0x100] sm:$0xff] %v554_v10  ;;  %v476_v13 = vadd.f32 %v475_v11, %v1017_v6  ;;  %v556_v14 = vadd.f32 %v555_v12, %v1017_v6 }
 0x121   :  { %v477_v15 = vpop.f32.mrf.mxu0  ;;  %v557_v16 = vpop.f32.mrf.mxu1 }
 0x122   :  { %633 = vst [vmem:[#allocation7 + $0x8] sm:$0xff] %v476_v13  ;;  %665 = vst [vmem:[#allocation7 + $0x108] sm:$0xff] %v556_v14  ;;  %v478_v17 = vadd.f32 %v477_v15, %v1015_v5  ;;  %v558_v18 = vadd.f32 %v557_v16, %v1015_v5 }
 0x123   :  { %v479_v19 = vpop.f32.mrf.mxu0  ;;  %v559_v20 = vpop.f32.mrf.mxu1 }
 0x124   :  { %634 = vst [vmem:[#allocation7 + $0x10] sm:$0xff] %v478_v17  ;;  %666 = vst [vmem:[#allocation7 + $0x110] sm:$0xff] %v558_v18  ;;  %v480_v21 = vadd.f32 %v479_v19, %v1017_v6  ;;  %v560_v22 = vadd.f32 %v559_v20, %v1017_v6 }
 0x125   :  { %v483_v23 = vpop.f32.mrf.mxu0  ;;  %v563_v24 = vpop.f32.mrf.mxu1 }
 0x126   :  { %635 = vst [vmem:[#allocation7 + $0x18] sm:$0xff] %v480_v21  ;;  %667 = vst [vmem:[#allocation7 + $0x118] sm:$0xff] %v560_v22  ;;  %v484_v25 = vadd.f32 %v483_v23, %v1015_v5  ;;  %v564_v26 = vadd.f32 %v563_v24, %v1015_v5 }
 0x127   :  { %v485_v27 = vpop.f32.mrf.mxu0  ;;  %v565_v28 = vpop.f32.mrf.mxu1 }
 0x128   :  { %636 = vst [vmem:[#allocation7 + $0x20] sm:$0xff] %v484_v25  ;;  %668 = vst [vmem:[#allocation7 + $0x120] sm:$0xff] %v564_v26  ;;  %v486_v29 = vadd.f32 %v485_v27, %v1017_v6  ;;  %v566_v30 = vadd.f32 %v565_v28, %v1017_v6 }
 0x129   :  { %v487_v31 = vpop.f32.mrf.mxu0  ;;  %v567_v32 = vpop.f32.mrf.mxu1 }
 0x12a   :  { %637 = vst [vmem:[#allocation7 + $0x28] sm:$0xff] %v486_v29  ;;  %669 = vst [vmem:[#allocation7 + $0x128] sm:$0xff] %v566_v30  ;;  %v488_v33 = vadd.f32 %v487_v31, %v1015_v5  ;;  %v568_v34 = vadd.f32 %v567_v32, %v1015_v5 }
 0x12b   :  { %v489_v35 = vpop.f32.mrf.mxu0  ;;  %v569_v36 = vpop.f32.mrf.mxu1 }
 0x12c   :  { %638 = vst [vmem:[#allocation7 + $0x30] sm:$0xff] %v488_v33  ;;  %670 = vst [vmem:[#allocation7 + $0x130] sm:$0xff] %v568_v34  ;;  %v490_v37 = vadd.f32 %v489_v35, %v1017_v6  ;;  %v570_v38 = vadd.f32 %v569_v36, %v1017_v6 }
 0x12d   :  { %v493_v39 = vpop.f32.mrf.mxu0  ;;  %v573_v40 = vpop.f32.mrf.mxu1 }
 0x12e   :  { %639 = vst [vmem:[#allocation7 + $0x38] sm:$0xff] %v490_v37  ;;  %671 = vst [vmem:[#allocation7 + $0x138] sm:$0xff] %v570_v38  ;;  %v494_v41 = vadd.f32 %v493_v39, %v1015_v5  ;;  %v574_v42 = vadd.f32 %v573_v40, %v1015_v5 }
 0x12f   :  { %v495_v43 = vpop.f32.mrf.mxu0  ;;  %v575_v44 = vpop.f32.mrf.mxu1 }
 0x130   :  { %640 = vst [vmem:[#allocation7 + $0x40] sm:$0xff] %v494_v41  ;;  %672 = vst [vmem:[#allocation7 + $0x140] sm:$0xff] %v574_v42  ;;  %v496_v45 = vadd.f32 %v495_v43, %v1017_v6  ;;  %v576_v46 = vadd.f32 %v575_v44, %v1017_v6 }
 0x131   :  { %v497_v47 = vpop.f32.mrf.mxu0  ;;  %v577_v48 = vpop.f32.mrf.mxu1 }
 0x132   :  { %641 = vst [vmem:[#allocation7 + $0x48] sm:$0xff] %v496_v45  ;;  %673 = vst [vmem:[#allocation7 + $0x148] sm:$0xff] %v576_v46  ;;  %v498_v49 = vadd.f32 %v497_v47, %v1015_v5  ;;  %v578_v50 = vadd.f32 %v577_v48, %v1015_v5 }
 0x133   :  { %v499_v51 = vpop.f32.mrf.mxu0  ;;  %v579_v52 = vpop.f32.mrf.mxu1 }
 0x134   :  { %642 = vst [vmem:[#allocation7 + $0x50] sm:$0xff] %v498_v49  ;;  %674 = vst [vmem:[#allocation7 + $0x150] sm:$0xff] %v578_v50  ;;  %v500_v53 = vadd.f32 %v499_v51, %v1017_v6  ;;  %v580_v54 = vadd.f32 %v579_v52, %v1017_v6 }
 0x135   :  { %v503_v55 = vpop.f32.mrf.mxu0  ;;  %v583_v56 = vpop.f32.mrf.mxu1 }
 0x136   :  { %643 = vst [vmem:[#allocation7 + $0x58] sm:$0xff] %v500_v53  ;;  %675 = vst [vmem:[#allocation7 + $0x158] sm:$0xff] %v580_v54  ;;  %v504_v57 = vadd.f32 %v503_v55, %v1015_v5  ;;  %v584_v58 = vadd.f32 %v583_v56, %v1015_v5 }
 0x137   :  { %v505_v59 = vpop.f32.mrf.mxu0  ;;  %v585_v60 = vpop.f32.mrf.mxu1 }
 0x138   :  { %644 = vst [vmem:[#allocation7 + $0x60] sm:$0xff] %v504_v57  ;;  %676 = vst [vmem:[#allocation7 + $0x160] sm:$0xff] %v584_v58  ;;  %v506_v61 = vadd.f32 %v505_v59, %v1017_v6  ;;  %v586_v62 = vadd.f32 %v585_v60, %v1017_v6 }
 0x139   :  { %v507_v63 = vpop.f32.mrf.mxu0  ;;  %v587_v0 = vpop.f32.mrf.mxu1 }
 0x13a   :  { %645 = vst [vmem:[#allocation7 + $0x68] sm:$0xff] %v506_v61  ;;  %677 = vst [vmem:[#allocation7 + $0x168] sm:$0xff] %v586_v62  ;;  %v508_v1 = vadd.f32 %v507_v63, %v1015_v5  ;;  %v588_v2 = vadd.f32 %v587_v0, %v1015_v5 }
 0x13b   :  { %v509_v3 = vpop.f32.mrf.mxu0  ;;  %v589_v4 = vpop.f32.mrf.mxu1 }
 0x13c   :  { %646 = vst [vmem:[#allocation7 + $0x70] sm:$0xff] %v508_v1  ;;  %678 = vst [vmem:[#allocation7 + $0x170] sm:$0xff] %v588_v2  ;;  %v510_v7 = vadd.f32 %v509_v3, %v1017_v6  ;;  %v590_v8 = vadd.f32 %v589_v4, %v1017_v6 }
 0x13d   :  { %v513_v9 = vpop.f32.mrf.mxu0  ;;  %v593_v10 = vpop.f32.mrf.mxu1 }
 0x13e   :  { %647 = vst [vmem:[#allocation7 + $0x78] sm:$0xff] %v510_v7  ;;  %679 = vst [vmem:[#allocation7 + $0x178] sm:$0xff] %v590_v8  ;;  %v514_v11 = vadd.f32 %v513_v9, %v1015_v5  ;;  %v594_v12 = vadd.f32 %v593_v10, %v1015_v5 }
 0x13f   :  { %v515_v13 = vpop.f32.mrf.mxu0  ;;  %v595_v14 = vpop.f32.mrf.mxu1 }
 0x140   :  { %648 = vst [vmem:[#allocation7 + $0x80] sm:$0xff] %v514_v11  ;;  %680 = vst [vmem:[#allocation7 + $0x180] sm:$0xff] %v594_v12  ;;  %v516_v15 = vadd.f32 %v515_v13, %v1017_v6  ;;  %v596_v16 = vadd.f32 %v595_v14, %v1017_v6 }
 0x141   :  { %v517_v17 = vpop.f32.mrf.mxu0  ;;  %v597_v18 = vpop.f32.mrf.mxu1 }
 0x142   :  { %649 = vst [vmem:[#allocation7 + $0x88] sm:$0xff] %v516_v15  ;;  %681 = vst [vmem:[#allocation7 + $0x188] sm:$0xff] %v596_v16  ;;  %v518_v19 = vadd.f32 %v517_v17, %v1015_v5  ;;  %v598_v20 = vadd.f32 %v597_v18, %v1015_v5 }
 0x143   :  { %v519_v21 = vpop.f32.mrf.mxu0  ;;  %v599_v22 = vpop.f32.mrf.mxu1 }
 0x144   :  { %650 = vst [vmem:[#allocation7 + $0x90] sm:$0xff] %v518_v19  ;;  %682 = vst [vmem:[#allocation7 + $0x190] sm:$0xff] %v598_v20  ;;  %v520_v23 = vadd.f32 %v519_v21, %v1017_v6  ;;  %v600_v24 = vadd.f32 %v599_v22, %v1017_v6 }
 0x145   :  { %v523_v25 = vpop.f32.mrf.mxu0  ;;  %v603_v26 = vpop.f32.mrf.mxu1 }
 0x146   :  { %651 = vst [vmem:[#allocation7 + $0x98] sm:$0xff] %v520_v23  ;;  %683 = vst [vmem:[#allocation7 + $0x198] sm:$0xff] %v600_v24  ;;  %v524_v27 = vadd.f32 %v523_v25, %v1015_v5  ;;  %v604_v28 = vadd.f32 %v603_v26, %v1015_v5 }
 0x147   :  { %v525_v29 = vpop.f32.mrf.mxu0  ;;  %v605_v30 = vpop.f32.mrf.mxu1 }
 0x148   :  { %652 = vst [vmem:[#allocation7 + $0xa0] sm:$0xff] %v524_v27  ;;  %684 = vst [vmem:[#allocation7 + $0x1a0] sm:$0xff] %v604_v28  ;;  %v526_v31 = vadd.f32 %v525_v29, %v1017_v6  ;;  %v606_v32 = vadd.f32 %v605_v30, %v1017_v6 }
 0x149   :  { %v527_v33 = vpop.f32.mrf.mxu0  ;;  %v607_v34 = vpop.f32.mrf.mxu1 }
 0x14a   :  { %653 = vst [vmem:[#allocation7 + $0xa8] sm:$0xff] %v526_v31  ;;  %685 = vst [vmem:[#allocation7 + $0x1a8] sm:$0xff] %v606_v32  ;;  %v528_v35 = vadd.f32 %v527_v33, %v1015_v5  ;;  %v608_v36 = vadd.f32 %v607_v34, %v1015_v5 }
 0x14b   :  { %v529_v37 = vpop.f32.mrf.mxu0  ;;  %v609_v38 = vpop.f32.mrf.mxu1 }
 0x14c   :  { %654 = vst [vmem:[#allocation7 + $0xb0] sm:$0xff] %v528_v35  ;;  %686 = vst [vmem:[#allocation7 + $0x1b0] sm:$0xff] %v608_v36  ;;  %v530_v39 = vadd.f32 %v529_v37, %v1017_v6  ;;  %v610_v40 = vadd.f32 %v609_v38, %v1017_v6 }
 0x14d   :  { %v533_v41 = vpop.f32.mrf.mxu0  ;;  %v613_v42 = vpop.f32.mrf.mxu1 }
 0x14e   :  { %655 = vst [vmem:[#allocation7 + $0xb8] sm:$0xff] %v530_v39  ;;  %687 = vst [vmem:[#allocation7 + $0x1b8] sm:$0xff] %v610_v40  ;;  %v534_v43 = vadd.f32 %v533_v41, %v1015_v5  ;;  %v614_v44 = vadd.f32 %v613_v42, %v1015_v5 }
 0x14f   :  { %v535_v45 = vpop.f32.mrf.mxu0  ;;  %v615_v46 = vpop.f32.mrf.mxu1 }
 0x150   :  { %656 = vst [vmem:[#allocation7 + $0xc0] sm:$0xff] %v534_v43  ;;  %688 = vst [vmem:[#allocation7 + $0x1c0] sm:$0xff] %v614_v44  ;;  %v536_v47 = vadd.f32 %v535_v45, %v1017_v6  ;;  %v616_v48 = vadd.f32 %v615_v46, %v1017_v6 }
 0x151   :  { %v537_v49 = vpop.f32.mrf.mxu0  ;;  %v617_v50 = vpop.f32.mrf.mxu1 }
 0x152   :  { %657 = vst [vmem:[#allocation7 + $0xc8] sm:$0xff] %v536_v47  ;;  %689 = vst [vmem:[#allocation7 + $0x1c8] sm:$0xff] %v616_v48  ;;  %v538_v51 = vadd.f32 %v537_v49, %v1015_v5  ;;  %v618_v52 = vadd.f32 %v617_v50, %v1015_v5 }
 0x153   :  { %v539_v53 = vpop.f32.mrf.mxu0  ;;  %v619_v54 = vpop.f32.mrf.mxu1 }
 0x154   :  { %658 = vst [vmem:[#allocation7 + $0xd0] sm:$0xff] %v538_v51  ;;  %690 = vst [vmem:[#allocation7 + $0x1d0] sm:$0xff] %v618_v52  ;;  %v540_v55 = vadd.f32 %v539_v53, %v1017_v6  ;;  %v620_v56 = vadd.f32 %v619_v54, %v1017_v6 }
 0x155   :  { %v543_v57 = vpop.f32.mrf.mxu0  ;;  %v623_v58 = vpop.f32.mrf.mxu1 }
 0x156   :  { %659 = vst [vmem:[#allocation7 + $0xd8] sm:$0xff] %v540_v55  ;;  %691 = vst [vmem:[#allocation7 + $0x1d8] sm:$0xff] %v620_v56  ;;  %v544_v59 = vadd.f32 %v543_v57, %v1015_v5  ;;  %v624_v60 = vadd.f32 %v623_v58, %v1015_v5 }
 0x157   :  { %v545_v61 = vpop.f32.mrf.mxu0  ;;  %v625_v62 = vpop.f32.mrf.mxu1 }
 0x158   :  { %660 = vst [vmem:[#allocation7 + $0xe0] sm:$0xff] %v544_v59  ;;  %692 = vst [vmem:[#allocation7 + $0x1e0] sm:$0xff] %v624_v60  ;;  %v546_v63 = vadd.f32 %v545_v61, %v1017_v6  ;;  %v626_v0 = vadd.f32 %v625_v62, %v1017_v6 }
 0x159   :  { %v547_v1 = vpop.f32.mrf.mxu0  ;;  %v627_v2 = vpop.f32.mrf.mxu1 }
 0x15a   :  { %661 = vst [vmem:[#allocation7 + $0xe8] sm:$0xff] %v546_v63  ;;  %693 = vst [vmem:[#allocation7 + $0x1e8] sm:$0xff] %v626_v0  ;;  %v548_v3 = vadd.f32 %v547_v1, %v1015_v5  ;;  %v628_v4 = vadd.f32 %v627_v2, %v1015_v5 }
 0x15b   :  { %v549_v7 = vpop.f32.mrf.mxu0  ;;  %v629_v8 = vpop.f32.mrf.mxu1 }
 0x15c   :  { %662 = vst [vmem:[#allocation7 + $0xf0] sm:$0xff] %v548_v3  ;;  %694 = vst [vmem:[#allocation7 + $0x1f0] sm:$0xff] %v628_v4  ;;  %v550_v9 = vadd.f32 %v549_v7, %v1017_v6  ;;  %v630_v10 = vadd.f32 %v629_v8, %v1017_v6 }
 0x15e   :  { %663 = vst [vmem:[#allocation7 + $0xf8] sm:$0xff] %v550_v9  ;;  %695 = vst [vmem:[#allocation7 + $0x1f8] sm:$0xff] %v630_v10 }
 0x15f   :  { %964 = shalt.err (!%p961_p0)
}
 0x160   :  { %s984_s26 = smov 256   ;;  %s985_s27 = smov 16  }
 0x161   :  { %707 = dma.vmem_to_hbm [thread:$0]  %s702_s24, 8192, %s1089_s3, [#allocation4], %s984_s26, %s984_s26, %s985_s27  }
 0x162   :  { %977 = dma.done.wait [#allocation4], 8192  }
 0x163   :  { %978 = vsyncadd [#allocation4], 4294959104 }
 0x164   :  { %711 = vsyncpa [#allocation3], 1 }
 0x165   :  { %712 = vsyncpa [#allocation6], 1 }
 0x166   :  { %713 = vsyncpa [#allocation4], 1 }

</bundles_post_ra>
